<compile_context>
chip_gen: v7x
topology: tpu7x:2x2x1
jax: 0.10.0
libtpu: 0.0.40
codegen_flags: <defaults>
</compile_context>

<pallas_src>
import functools

import jax
import jax.numpy as jnp
from jax import lax
from jax.experimental import pallas as pl
from jax.experimental.pallas import tpu as pltpu


_LANE = 128
_TILE_BYTES = 2 * 1024 * 1024   # per-buffer x-tile budget (double-buffered -> ~4 MiB)
_MAX_ROW_TILE = 128             # keeps the register carry at <= 16 vregs


def _rowsum_kernel(x_ref, o_ref, acc_ref, *, rows_t, s_t):
    # x_ref:   (rows_t, s_t)      input tile, native dtype (upcast in-register)
    # o_ref:   (1, rows_t, 128)   f32 lane-resident partial row sums
    # acc_ref: (rows_t, 128)      f32 accumulator, resident across the s axis
    s = pl.program_id(2)

    @pl.when(s == 0)
    def _():
        acc_ref[...] = jnp.zeros_like(acc_ref)

    if s_t % _LANE == 0:
        # Pure-VPU path: add 128-lane chunks into a register carry; the only
        # cross-lane reduce happens once, in the XLA wrapper.
        lane_chunks = s_t // _LANE
        unroll = max(1, min(8, lane_chunks))

        def body(k, carry):
            start = pl.multiple_of(k * _LANE, _LANE)
            return carry + x_ref[:, pl.ds(start, _LANE)].astype(jnp.float32)

        part = lax.fori_loop(0, lane_chunks, body,
                             jnp.zeros((rows_t, _LANE), jnp.float32),
                             unroll=unroll)
        acc_ref[...] += part
    else:
        # Fallback (s_t == S and S is not a multiple of 128): one cross-lane
        # reduce per tile, deposited into lane 0 of the accumulator.
        row_sum = jnp.sum(x_ref[...].astype(jnp.float32), axis=-1, keepdims=True)
        lane_id = lax.broadcasted_iota(jnp.int32, (rows_t, _LANE), 1)
        acc_ref[...] += jnp.where(lane_id == 0, row_sum, 0.0)

    @pl.when(s == pl.num_programs(2) - 1)
    def _():
        o_ref[0] = acc_ref[...]


def _pick_row_tile(rows, sub_mult, cap):
    """Largest multiple-of-sub_mult divisor of `rows` that is <= cap."""
    best = None
    r = sub_mult
    limit = min(rows, cap)
    while r <= limit:
        if rows % r == 0:
            best = r
        r += sub_mult
    return best if best is not None else rows   # full-extent fallback


def _pick_lane_tile(s, rows_t, itemsize, budget_bytes):
    """Largest multiple-of-128 divisor of `s` fitting the per-buffer budget."""
    best = None
    max_lanes = max(_LANE, budget_bytes // max(1, rows_t * itemsize))
    c = _LANE
    limit = min(s, max_lanes)
    while c <= limit:
        if s % c == 0:
            best = c
        c += _LANE
    return best if best is not None else s      # full-extent fallback


def auxiliary_layer(x_nchw, weight, bias):
    """x_nchw: (N, Cin, H, W); weight: (Cout, Cin) or (Cout, Cin, 1, 1);
    bias: (Cout,).  Returns (N, Cout) float32."""
    N, Cin, H, W = x_nchw.shape
    if weight.ndim == 4:
        weight = weight.reshape(weight.shape[0], weight.shape[1])
    Cout = weight.shape[0]
    S = H * W
    R = N * Cin

    # Free reshape of contiguous NCHW: rows = (n, c) pairs, lanes = spatial.
    x2d = x_nchw.reshape(R, S)
    itemsize = jnp.dtype(x_nchw.dtype).itemsize
    # Sublane packing: rows_t multiple of 8 (f32), 16 (bf16), 32 (int8/fp8).
    sub_mult = 8 * max(1, 4 // itemsize)

    rows_t = _pick_row_tile(R, sub_mult, _MAX_ROW_TILE)
    s_t = _pick_lane_tile(S, rows_t, itemsize, _TILE_BYTES)
    # Divisibility is guaranteed by construction (exact divisor or full dim).
    assert R % rows_t == 0 and S % s_t == 0
    row_blocks = R // rows_t
    s_blocks = S // s_t

    # If the row axis has a single tile, split the spatial reduction two ways
    # on a leading parallel axis so v7x's two TensorCores both get work; the
    # two partial sums are combined in the wrapper.
    p = 2 if (row_blocks == 1 and s_blocks >= 2 and s_blocks % 2 == 0) else 1
    s_per_p = s_blocks // p

    grid = (p, row_blocks, s_per_p)
    kernel = functools.partial(_rowsum_kernel, rows_t=rows_t, s_t=s_t)

    partial_sums = pl.pallas_call(
        kernel,
        out_shape=jax.ShapeDtypeStruct((p, R, _LANE), jnp.float32),
        grid_spec=pltpu.PrefetchScalarGridSpec(
            num_scalar_prefetch=0,
            grid=grid,
            in_specs=[
                pl.BlockSpec((rows_t, s_t),
                             lambda pi, ri, si: (ri, pi * s_per_p + si)),
            ],
            out_specs=pl.BlockSpec((1, rows_t, _LANE),
                                   lambda pi, ri, si: (pi, ri, 0)),
            scratch_shapes=[pltpu.VMEM((rows_t, _LANE), jnp.float32)],
        ),
        compiler_params=pltpu.CompilerParams(
            dimension_semantics=("parallel", "parallel", "arbitrary"),
            vmem_limit_bytes=32 * 1024 * 1024,
        ),
    )(x2d)

    # Tiny finalization in plain XLA: partition/lane reduce, mean, 1x1 conv.
    sums = jnp.sum(partial_sums, axis=(0, 2))              # (R,)
    xbar = sums.reshape(N, Cin) * jnp.float32(1.0 / S)     # spatial mean (N, Cin)
    w_t = weight.astype(jnp.float32).T                     # (Cin, Cout)
    b = bias.astype(jnp.float32)[None, :]
    return xbar @ w_t + b


def _reference(x_nchw, weight, bias):
    # Pure-JAX reference: 1x1 conv (einsum over channels) then spatial mean.
    y = jnp.einsum("nchw,kc->nkhw", x_nchw, weight) + bias[None, :, None, None]
    return jnp.mean(y, axis=(2, 3))


if __name__ == "__main__":
    key = jax.random.PRNGKey(0)
    num_classes = 8

    shapes = [
        (2, 4, 16, 16),     # nominal module shape: single grid step
        (2, 4, 64, 64),     # larger spatial extent, one big lane-dense tile
        (2, 4, 512, 512),   # multi-step S reduction + 2-way spatial split
        (16, 32, 32, 32),   # multiple row tiles (parallel row axis)
    ]
    for (N, Cin, H, W) in shapes:
        key, kx, kw, kb = jax.random.split(key, 4)
        x = jax.random.normal(kx, (N, Cin, H, W), dtype=jnp.float32)
        weight = jax.random.normal(kw, (num_classes, Cin), dtype=jnp.float32) * 0.1
        bias = jax.random.normal(kb, (num_classes,), dtype=jnp.float32) * 0.1

        out = jax.block_until_ready(auxiliary_layer(x, weight, bias))
        ref = _reference(x, weight, bias)

        assert out.shape == (N, num_classes), out.shape
        err = float(jnp.max(jnp.abs(out - ref)))
        assert jnp.allclose(out, ref, atol=1e-4, rtol=1e-4), (
            f"shape {(N, Cin, H, W)}: max abs err = {err}")

    print("KERNEL_OK")
</pallas_src>

<mosaic_0001>
module attributes {stable_mosaic.version = 11 : i64} {
  func.func @_rowsum_kernel(%arg0: i32, %arg1: i32, %arg2: i32, %arg3: memref<8x256xf32, #tpu.memory_space<vmem>>, %arg4: memref<1x8x128xf32, #tpu.memory_space<vmem>>, %arg5: memref<8x128xf32, #tpu.memory_space<vmem>>) attributes {dimension_semantics = [#tpu.dimension_semantics<parallel>, #tpu.dimension_semantics<parallel>, #tpu.dimension_semantics<arbitrary>], iteration_bounds = array<i64: 1, 1, 1>, scalar_prefetch = 0 : i64, scratch_operands = 1 : i64, tpu.core_type = #tpu.core_type<tc>, window_params = [{transform_indices = @transform_0, window_bounds = array<i64: 8, 256>}, {transform_indices = @transform_1, window_bounds = array<i64: 1, 8, 128>}]} {
    %c0_i32 = arith.constant 0 : i32
    %0 = arith.cmpi eq, %arg2, %c0_i32 : i32
    %1 = arith.extui %0 : i1 to i32
    %c0_i32_0 = arith.constant 0 : i32
    %2 = arith.cmpi ne, %1, %c0_i32_0 : i32
    scf.if %2 {
      %cst_10 = arith.constant 0.000000e+00 : f32
      %20 = vector.broadcast %cst_10 : f32 to vector<8x128xf32>
      %c0_11 = arith.constant 0 : index
      %c0_12 = arith.constant 0 : index
      %21 = vector.load %arg5[%c0_11, %c0_12] : memref<8x128xf32, #tpu.memory_space<vmem>>, vector<8x128xf32>
      tpu.vector_store %arg5[%c0_11, %c0_12], %20 {strides = array<i32>} : memref<8x128xf32, #tpu.memory_space<vmem>>, vector<8x128xf32>,
    } else {
    }
    %cst = arith.constant 0.000000e+00 : f32
    %3 = vector.broadcast %cst : f32 to vector<8x128xf32>
    %c0_i32_1 = arith.constant 0 : i32
    %c128_i32 = arith.constant 128 : i32
    %4 = arith.muli %c0_i32_1, %c128_i32 : i32
    %5 = tpu.assume_multiple %4, 128 : i32
    %c0 = arith.constant 0 : index
    %6 = arith.index_cast %5 : i32 to index
    %7 = vector.load %arg3[%c0, %6] : memref<8x256xf32, #tpu.memory_space<vmem>>, vector<8x128xf32>
    %8 = arith.addf %3, %7 : vector<8x128xf32>
    %c1_i32 = arith.constant 1 : i32
    %c128_i32_2 = arith.constant 128 : i32
    %9 = arith.muli %c1_i32, %c128_i32_2 : i32
    %10 = tpu.assume_multiple %9, 128 : i32
    %c0_3 = arith.constant 0 : index
    %11 = arith.index_cast %10 : i32 to index
    %12 = vector.load %arg3[%c0_3, %11] : memref<8x256xf32, #tpu.memory_space<vmem>>, vector<8x128xf32>
    %13 = arith.addf %8, %12 : vector<8x128xf32>
    %c2_i32 = arith.constant 2 : i32
    %c0_4 = arith.constant 0 : index
    %c0_5 = arith.constant 0 : index
    %14 = vector.load %arg5[%c0_4, %c0_5] : memref<8x128xf32, #tpu.memory_space<vmem>>, vector<8x128xf32>
    %15 = arith.addf %14, %13 : vector<8x128xf32>
    %c0_6 = arith.constant 0 : index
    %c0_7 = arith.constant 0 : index
    %16 = vector.load %arg5[%c0_6, %c0_7] : memref<8x128xf32, #tpu.memory_space<vmem>>, vector<8x128xf32>
    tpu.vector_store %arg5[%c0_6, %c0_7], %15 {strides = array<i32>} : memref<8x128xf32, #tpu.memory_space<vmem>>, vector<8x128xf32>,
    %c0_i32_8 = arith.constant 0 : i32
    %17 = arith.cmpi eq, %arg2, %c0_i32_8 : i32
    %18 = arith.extui %17 : i1 to i32
    %c0_i32_9 = arith.constant 0 : i32
    %19 = arith.cmpi ne, %18, %c0_i32_9 : i32
    scf.if %19 {
      %c0_10 = arith.constant 0 : index
      %c0_11 = arith.constant 0 : index
      %20 = vector.load %arg5[%c0_10, %c0_11] : memref<8x128xf32, #tpu.memory_space<vmem>>, vector<8x128xf32>
      %c0_12 = arith.constant 0 : index
      %c0_13 = arith.constant 0 : index
      %c0_14 = arith.constant 0 : index
      %21 = vector.load %arg4[%c0_12, %c0_13, %c0_14] : memref<1x8x128xf32, #tpu.memory_space<vmem>>, vector<1x8x128xf32>
      %22 = vector.shape_cast %21 : vector<1x8x128xf32> to vector<8x128xf32>
      %23 = vector.shape_cast %20 : vector<8x128xf32> to vector<1x8x128xf32>
      tpu.vector_store %arg4[%c0_12, %c0_13, %c0_14], %23 {strides = array<i32>} : memref<1x8x128xf32, #tpu.memory_space<vmem>>, vector<1x8x128xf32>,
    } else {
    }
    return
  }
  func.func @transform_0(%arg0: i32, %arg1: i32, %arg2: i32) -> (i32, i32) {
    %c1_i32 = arith.constant 1 : i32
    %0 = arith.muli %arg0, %c1_i32 : i32
    %1 = arith.addi %0, %arg2 : i32
    %c0_i32 = arith.constant 0 : i32
    return %arg1, %1 : i32, i32
  }
  func.func @transform_1(%arg0: i32, %arg1: i32, %arg2: i32) -> (i32, i32, i32) {
    %c0_i32 = arith.constant 0 : i32
    %c0_i32_0 = arith.constant 0 : i32
    return %arg0, %arg1, %c0_i32 : i32, i32, i32
  }
}

</mosaic_0001>

<bundles_post_ra>
// kernel: tpu_custom_call.1
= control target key start
LH: loop header
LB: loop body
LE: loop exit
PB: predicated region body
PF: predicated region fallthrough
CT: control target
= control target key end

     0   :  { %6 = vsyncpa [#allocation4], 0  ;;  %s146_s0 = inlined_call_operand.hbm [shape: f32[8,256], index: 0, kind: input, shape index: {}]   ;;  %s147_s1 = inlined_call_operand.hbm [shape: f32[1,8,128], index: 1, kind: output, shape index: {}]  }
   0x1   :  { %7 = vsyncpa [#allocation5], 0  ;;  %s110_s6 = smov [#allocation3]   ;;  %s62_s10 = scalar_lea.hbm %s146_s0, 256 }
   0x2   :  { %s18_s7 = sshll.u32 %s110_s6, 4  ;;  %p63_p0 = scmp.ne.s32.totalorder %s146_s0, %s62_s10  ;;  %s19_s7 = int_to_ptr.vmem [resolvable:$true] %s18_s7 }
   0x3   :  { %p66_p1 = scmp.lt.u32.totalorder %s62_s10, %s146_s0 }
   0x5   :  { %p68_p2 = pnand %p66_p1, %p63_p0 }
   0x7   :  { %71 = shalt.err (!%p68_p2)
}
   0x8   :  { %s72_s15 = scalar_lea.vmem %s19_s7, 256  ;;  %p77_p4 = scmp.lt.s32.totalorder %s19_s7, %s19_s7 }
   0x9   :  { %p73_p3 = scmp.ne.s32.totalorder %s19_s7, %s72_s15  ;;  %p78_p5 = scmp.lt.s32.totalorder %s72_s15, %s72_s15 }
   0xb   :  { %p79_p6 = por %p78_p5, %p77_p4 }
   0xd   :  { %p80_p7 = pnand %p79_p6, %p73_p3 }
   0xf   :  { %83 = shalt.err (!%p80_p7)
}
  0x10   :  { %21 = dma.hbm_to_vmem [thread:$0]  %s146_s0, 256, %s19_s7, [#allocation4]  }
  0x11   :  { %106 = dma.done.wait [#allocation4], 256  }
  0x12   :  { %107 = vsyncadd [#allocation4], 4294967040  ;;  %s111_s18 = smov [#allocation6]   ;;  %v32_v0 = vld [vmem:[#allocation3] sm:$0xff]  ;;  %v35_v1 = vld [vmem:[#allocation3 + $0x8] sm:$0xff] }
  0x13   :  { %s51_s19 = sshll.u32 %s111_s18, 4  ;;  %v36_v2 = vadd.f32 %v35_v1, %v32_v0  ;;  %s52_s19 = int_to_ptr.vmem [resolvable:$true] %s51_s19 }
  0x14   :  { %s84_s20 = scalar_lea.vmem %s52_s19, 128  ;;  %p89_p9 = scmp.lt.s32.totalorder %s52_s19, %s52_s19 }
  0x15   :  { %44 = vst [vmem:[#allocation6] sm:$0xff] %v36_v2  ;;  %p85_p8 = scmp.ne.s32.totalorder %s52_s19, %s84_s20  ;;  %p90_p10 = scmp.lt.s32.totalorder %s84_s20, %s84_s20 }
  0x17   :  { %p91_p11 = por %p90_p10, %p89_p9 }
  0x19   :  { %p92_p12 = pnand %p91_p11, %p85_p8 }
  0x1b   :  { %95 = shalt.err (!%p92_p12)
}
  0x1c   :  { %s96_s0 = scalar_lea.hbm %s147_s1, 128 }
  0x1d   :  { %p97_p13 = scmp.ne.s32.totalorder %s147_s1, %s96_s0  ;;  %p100_p0 = scmp.lt.u32.totalorder %s96_s0, %s147_s1 }
  0x1f   :  { %p102_p1 = pnand %p100_p0, %p97_p13 }
  0x21   :  { %105 = shalt.err (!%p102_p1)
}
  0x22   :  { %54 = dma.vmem_to_hbm [thread:$0]  %s52_s19, 128, %s147_s1, [#allocation5]  }
  0x23   :  { %108 = dma.done.wait [#allocation5], 128  }
  0x24   :  { %109 = vsyncadd [#allocation5], 4294967168 }
  0x25   :  { %58 = vsyncpa [#allocation4], 1 }
  0x26   :  { %59 = vsyncpa [#allocation5], 1 }

</bundles_post_ra>
